<compile_context>
chip_gen: v7x
topology: tpu7x:2x2x1
jax: 0.10.0
libtpu: 0.0.40
codegen_flags: <defaults>
</compile_context>

<pallas_src>
import math

import jax
import jax.numpy as jnp
from jax import lax
from jax.experimental import pallas as pl
from jax.experimental.pallas import tpu as pltpu

_EPS = 1e-5                      # nn.GroupNorm default eps
_INV_SQRT2 = 1.0 / math.sqrt(2.0)


# ---------------------------------------------------------------- kernel math
def _groupnorm(x, gamma, beta):
    # GroupNorm(num_groups=T, num_channels=T): one token row per group, so
    # stats are over the D axis, per (b, t), with biased variance.  f32 math.
    mean = jnp.mean(x, axis=-1, keepdims=True)
    xc = x - mean
    var = jnp.mean(xc * xc, axis=-1, keepdims=True)
    return xc * lax.rsqrt(var + _EPS) * gamma + beta


def _gelu_exact(x):
    # PyTorch nn.GELU() default (approximate='none'): 0.5*x*(1+erf(x/sqrt(2)))
    return 0.5 * x * (1.0 + lax.erf(x * _INV_SQRT2))


# --------------------------------------------------------------- kernels
def _mlp_channel_kernel(x_ref, gamma_ref, beta_ref, w1t_ref, b1_ref,
                        w2t_ref, b2_ref, o_ref, xn_ref, acc_ref):
    # x_ref/o_ref: (R, D) rows = B_blk*T.  Grid = (batch blocks, E blocks).
    ei = pl.program_id(1)

    @pl.when(ei == 0)
    def _():
        x = x_ref[...].astype(jnp.float32)                        # (R, D)
        xn = _groupnorm(x, gamma_ref[...], beta_ref[...])         # gamma/beta (R, 1)
        xn_ref[...] = xn.astype(xn_ref.dtype)                     # f32 or bf16
        acc_ref[...] = jnp.zeros_like(acc_ref)

    h = jnp.dot(xn_ref[...], w1t_ref[...],
                preferred_element_type=jnp.float32) + b1_ref[...]  # (R, E_blk)
    h = _gelu_exact(h)
    acc_ref[...] += jnp.dot(h.astype(w2t_ref.dtype), w2t_ref[...],
                            preferred_element_type=jnp.float32)    # (R, D)

    @pl.when(ei == pl.num_programs(1) - 1)
    def _():
        y = acc_ref[...] + b2_ref[...] + x_ref[...].astype(jnp.float32)
        o_ref[...] = y.astype(o_ref.dtype)


def _mlp_token_kernel(x_ref, gamma_ref, beta_ref, w1_ref, b1_ref,
                      w2_ref, b2_ref, o_ref):
    # x_ref/o_ref: (B_blk, T, D); weights full-resident (they are small: ExT).
    x = x_ref[...].astype(jnp.float32)                             # (B_blk, T, D)
    xn = _groupnorm(x, gamma_ref[...][None], beta_ref[...][None])  # gamma (T,1)
    xn = xn.astype(w1_ref.dtype)
    w1 = w1_ref[...]
    w2 = w2_ref[...]
    b1 = b1_ref[...].astype(jnp.float32)                           # (E, 1)
    b2 = b2_ref[...].astype(jnp.float32)                           # (T, 1)
    for b in range(x_ref.shape[0]):          # static unroll, B_blk kept <= 8
        h = jnp.dot(w1, xn[b], preferred_element_type=jnp.float32) + b1   # (E, D)
        h = _gelu_exact(h)
        y = jnp.dot(w2, h.astype(w2.dtype),
                    preferred_element_type=jnp.float32) + b2              # (T, D)
        o_ref[b] = (y + x[b]).astype(o_ref.dtype)


# ------------------------------------------------------------- tiling helpers
def _pick_batch_block(B, T, target_rows=512, min_rows_per_core=256):
    """Fold batch into the GEMM M dim: largest divisor of B with B_blk*T <=
    target_rows.  Keeps >= 2 parallel grid steps (v7x: 2 TensorCores) when
    each step still feeds >= min_rows_per_core rows to the MXU."""
    if B * T <= target_rows:
        if B % 2 == 0 and (B // 2) * T >= min_rows_per_core:
            return B // 2
        return B
    best = None
    for d in range(1, B + 1):
        rows = d * T
        if B % d == 0 and rows <= target_rows and rows % 8 == 0:
            best = d
    return best if best is not None else B


def _pick_e_block(E, D, w_itemsize, budget_bytes=8 * 1024 * 1024):
    """Tile the hidden axis so the double-buffered W1^T / W2^T slices stay
    within `budget_bytes` of VMEM (mandatory headroom on v7x's 64 MiB)."""
    per_e = 4 * D * w_itemsize                 # 2 matrices x 2 pipeline buffers
    cap = max(128, budget_bytes // max(per_e, 1))
    if E <= cap:
        return E
    for blk in range(cap - cap % 128, 0, -128):  # multiples of 128 (lane-dense)
        if E % blk == 0:
            return blk
    return E                                     # fallback: whole weight resident


def _pick_token_batch_block(B, cap=8):
    best = 1
    for d in range(1, min(B, cap) + 1):
        if B % d == 0:
            best = d
    return best


def _vmem_limit(estimate_bytes):
    try:
        cap = pltpu.get_tpu_info().vmem_capacity_bytes
    except Exception:
        cap = 64 * 1024 * 1024                   # conservative (v7x physical)
    want = int(1.5 * estimate_bytes) + (8 << 20)
    return int(min(max(want, 32 << 20), int(0.9 * cap)))


def _pad(s, m):
    return -(-s // m) * m


def _channel_vmem_bytes(R, D, e_blk, x_itemsize, w_itemsize):
    io = 2 * 2 * _pad(R, 8) * _pad(D, 128) * x_itemsize               # x + out
    wts = 2 * (_pad(D, 8) * _pad(e_blk, 128)
               + _pad(e_blk, 8) * _pad(D, 128)) * w_itemsize          # W slices
    vecs = 2 * (2 * _pad(R, 8) * 128 * 4
                + 8 * _pad(e_blk, 128) * 4 + 8 * _pad(D, 128) * 4)    # gamma/beta/b1/b2
    scr = _pad(R, 8) * _pad(D, 128) * (4 + w_itemsize)                # acc + xn
    return io + wts + vecs + scr


def _token_vmem_bytes(b_blk, T, D, E, x_itemsize, w_itemsize):
    io = 2 * 2 * b_blk * _pad(T, 8) * _pad(D, 128) * x_itemsize
    wts = 2 * (_pad(E, 8) * _pad(T, 128) + _pad(T, 8) * _pad(E, 128)) * w_itemsize
    vecs = 2 * (3 * _pad(T, 8) + _pad(E, 8)) * 128 * 4
    return io + wts + vecs


# ------------------------------------------------------------------- wrappers
def prepare_params(params, token_nr, mix_type, matmul_dtype=jnp.float32):
    """One-time parameter prep: hoists transposes / Conv1d squeeze / dtype
    casts off the per-forward path (no per-call full-weight HBM transpose)."""
    T = token_nr
    prep = {
        "gamma": params["norm_w"].astype(jnp.float32).reshape(T),
        "beta": params["norm_b"].astype(jnp.float32).reshape(T),
    }
    if mix_type == "token":
        E = params["w1"].shape[0]
        prep["w1"] = params["w1"].reshape(E, T).astype(matmul_dtype)   # (E, T)
        prep["b1"] = params["b1"].astype(jnp.float32).reshape(E, 1)
        prep["w2"] = params["w2"].reshape(T, E).astype(matmul_dtype)   # (T, E)
        prep["b2"] = params["b2"].astype(jnp.float32).reshape(T, 1)
    else:
        E, D = params["w1"].shape
        prep["w1t"] = params["w1"].T.astype(matmul_dtype)              # (D, E)
        prep["b1"] = params["b1"].astype(jnp.float32).reshape(1, E)
        prep["w2t"] = params["w2"].T.astype(matmul_dtype)              # (E, D)
        prep["b2"] = params["b2"].astype(jnp.float32).reshape(1, D)
    return prep


def _mlp_channel(x, prep):
    B, T, D = x.shape
    w1t, w2t = prep["w1t"], prep["w2t"]
    E = w1t.shape[1]
    mm_dtype = w1t.dtype

    b_blk = _pick_batch_block(B, T)
    R = b_blk * T                                   # GEMM M rows per grid step
    e_blk = _pick_e_block(E, D, mm_dtype.itemsize)
    n_b, n_e = B // b_blk, E // e_blk

    x2 = x.reshape(B * T, D)                        # metadata-only reshape
    gamma_rows = jnp.tile(prep["gamma"], b_blk).reshape(R, 1)
    beta_rows = jnp.tile(prep["beta"], b_blk).reshape(R, 1)

    vmem = _vmem_limit(_channel_vmem_bytes(R, D, e_blk,
                                           x.dtype.itemsize, mm_dtype.itemsize))

    out2 = pl.pallas_call(
        _mlp_channel_kernel,
        out_shape=jax.ShapeDtypeStruct((B * T, D), x.dtype),
        grid=(n_b, n_e),
        in_specs=[
            pl.BlockSpec((R, D), lambda bi, ei: (bi, 0)),        # x rows
            pl.BlockSpec((R, 1), lambda bi, ei: (0, 0)),         # gamma rows
            pl.BlockSpec((R, 1), lambda bi, ei: (0, 0)),         # beta rows
            pl.BlockSpec((D, e_blk), lambda bi, ei: (0, ei)),    # W1^T slice
            pl.BlockSpec((1, e_blk), lambda bi, ei: (0, ei)),    # b1 slice
            pl.BlockSpec((e_blk, D), lambda bi, ei: (ei, 0)),    # W2^T slice
            pl.BlockSpec((1, D), lambda bi, ei: (0, 0)),         # b2
        ],
        out_specs=pl.BlockSpec((R, D), lambda bi, ei: (bi, 0)),
        scratch_shapes=[pltpu.VMEM((R, D), mm_dtype),            # xn (GroupNorm out)
                        pltpu.VMEM((R, D), jnp.float32)],        # f32 accumulator
        compiler_params=pltpu.CompilerParams(
            dimension_semantics=("parallel", "arbitrary"),
            vmem_limit_bytes=vmem),
    )(x2, gamma_rows, beta_rows, w1t, prep["b1"], w2t, prep["b2"])
    return out2.reshape(B, T, D)


def _mlp_token(x, prep):
    B, T, D = x.shape
    w1, w2 = prep["w1"], prep["w2"]
    E = w1.shape[0]
    mm_dtype = w1.dtype

    b_blk = _pick_token_batch_block(B)
    n_b = B // b_blk
    vmem = _vmem_limit(_token_vmem_bytes(b_blk, T, D, E,
                                         x.dtype.itemsize, mm_dtype.itemsize))

    return pl.pallas_call(
        _mlp_token_kernel,
        out_shape=jax.ShapeDtypeStruct((B, T, D), x.dtype),
        grid=(n_b,),
        in_specs=[
            pl.BlockSpec((b_blk, T, D), lambda bi: (bi, 0, 0)),
            pl.BlockSpec((T, 1), lambda bi: (0, 0)),
            pl.BlockSpec((T, 1), lambda bi: (0, 0)),
            pl.BlockSpec((E, T), lambda bi: (0, 0)),
            pl.BlockSpec((E, 1), lambda bi: (0, 0)),
            pl.BlockSpec((T, E), lambda bi: (0, 0)),
            pl.BlockSpec((T, 1), lambda bi: (0, 0)),
        ],
        out_specs=pl.BlockSpec((b_blk, T, D), lambda bi: (bi, 0, 0)),
        compiler_params=pltpu.CompilerParams(
            dimension_semantics=("parallel",),
            vmem_limit_bytes=vmem),
    )(x, prep["gamma"].reshape(T, 1), prep["beta"].reshape(T, 1),
      w1, prep["b1"], w2, prep["b2"])


def mlp_layer(x, prep, mix_type):
    """x: (B, T, D). prep: output of prepare_params(...)."""
    if mix_type == "token":
        return _mlp_token(x, prep)
    return _mlp_channel(x, prep)


# --------------------------------------------------------------- pure-JAX ref
def mlp_layer_ref(x, params, mix_type):
    T = x.shape[1]
    mean = jnp.mean(x, axis=-1, keepdims=True)
    var = jnp.mean((x - mean) ** 2, axis=-1, keepdims=True)
    xn = (x - mean) / jnp.sqrt(var + _EPS)
    xn = xn * params["norm_w"].reshape(1, T, 1) + params["norm_b"].reshape(1, T, 1)
    gelu = lambda v: 0.5 * v * (1.0 + lax.erf(v * _INV_SQRT2))
    if mix_type == "token":
        w1 = params["w1"].reshape(params["w1"].shape[0], T)
        w2 = params["w2"].reshape(T, params["w2"].shape[1])
        h = gelu(jnp.einsum("et,btd->bed", w1, xn) + params["b1"][None, :, None])
        y = jnp.einsum("te,bed->btd", w2, h) + params["b2"][None, :, None]
    else:
        h = gelu(jnp.einsum("btd,ed->bte", xn, params["w1"]) + params["b1"])
        y = jnp.einsum("bte,de->btd", h, params["w2"]) + params["b2"]
    return y + x


# --------------------------------------------------------------------- main
def _make_params(key, token_nr, dim, dim_exp, mix_type):
    ks = jax.random.split(key, 6)
    p = {
        "norm_w": jax.random.normal(ks[0], (token_nr,), jnp.float32) * 0.5 + 1.0,
        "norm_b": jax.random.normal(ks[1], (token_nr,), jnp.float32) * 0.1,
    }
    if mix_type == "token":
        p["w1"] = jax.random.normal(ks[2], (dim_exp, token_nr, 1), jnp.float32) * 0.1
        p["b1"] = jax.random.normal(ks[3], (dim_exp,), jnp.float32) * 0.05
        p["w2"] = jax.random.normal(ks[4], (token_nr, dim_exp, 1), jnp.float32) * 0.1
        p["b2"] = jax.random.normal(ks[5], (token_nr,), jnp.float32) * 0.05
    else:
        p["w1"] = jax.random.normal(ks[2], (dim_exp, dim), jnp.float32) * 0.1
        p["b1"] = jax.random.normal(ks[3], (dim_exp,), jnp.float32) * 0.05
        p["w2"] = jax.random.normal(ks[4], (dim, dim_exp), jnp.float32) * 0.1
        p["b2"] = jax.random.normal(ks[5], (dim,), jnp.float32) * 0.05
    return p


if __name__ == "__main__":
    B, token_nr, dim, dim_exp = 2, 8, 32, 64
    key = jax.random.PRNGKey(0)
    kx, kp_tok, kp_ch = jax.random.split(key, 3)
    x = jax.random.normal(kx, (B, token_nr, dim), jnp.float32)

    for mix_type, kp in (("channel", kp_ch), ("token", kp_tok)):
        params = _make_params(kp, token_nr, dim, dim_exp, mix_type)
        ref = mlp_layer_ref(x, params, mix_type)

        # f32 MXU operands: matches PyTorch/reference numerics tightly.
        prep = prepare_params(params, token_nr, mix_type, matmul_dtype=jnp.float32)
        out = jax.block_until_ready(mlp_layer(x, prep, mix_type))
        assert out.shape == (B, token_nr, dim) and out.dtype == jnp.float32
        assert jnp.allclose(out, ref, rtol=1e-4, atol=1e-4), f"mismatch ({mix_type}, f32)"

        # bf16 MXU operands (2x MXU throughput, half weight VMEM); f32 accum,
        # f32 GroupNorm/GELU/residual — checked at a looser tolerance.
        prep16 = prepare_params(params, token_nr, mix_type, matmul_dtype=jnp.bfloat16)
        out16 = jax.block_until_ready(mlp_layer(x, prep16, mix_type))
        assert jnp.allclose(out16, ref, rtol=3e-2, atol=3e-2), f"mismatch ({mix_type}, bf16)"

    print("KERNEL_OK")
</pallas_src>

<mosaic_0001>
module attributes {stable_mosaic.version = 11 : i64} {
  func.func @_mlp_channel_kernel(%arg0: i32, %arg1: i32, %arg2: memref<16x32xf32, #tpu.memory_space<vmem>>, %arg3: memref<16x1xf32, #tpu.memory_space<vmem>>, %arg4: memref<16x1xf32, #tpu.memory_space<vmem>>, %arg5: memref<32x64xf32, #tpu.memory_space<vmem>>, %arg6: memref<1x64xf32, #tpu.memory_space<vmem>>, %arg7: memref<64x32xf32, #tpu.memory_space<vmem>>, %arg8: memref<1x32xf32, #tpu.memory_space<vmem>>, %arg9: memref<16x32xf32, #tpu.memory_space<vmem>>, %arg10: memref<16x32xf32, #tpu.memory_space<vmem>>, %arg11: memref<16x32xf32, #tpu.memory_space<vmem>>) attributes {dimension_semantics = [#tpu.dimension_semantics<parallel>, #tpu.dimension_semantics<arbitrary>], iteration_bounds = array<i64: 1, 1>, scalar_prefetch = 0 : i64, scratch_operands = 2 : i64, tpu.core_type = #tpu.core_type<tc>, window_params = [{transform_indices = @transform_0, window_bounds = array<i64: 16, 32>}, {pipeline_mode = #tpu.pipeline_mode<synchronous>, transform_indices = @transform_1, window_bounds = array<i64: 16, 1>}, {pipeline_mode = #tpu.pipeline_mode<synchronous>, transform_indices = @transform_2, window_bounds = array<i64: 16, 1>}, {transform_indices = @transform_3, window_bounds = array<i64: 32, 64>}, {transform_indices = @transform_4, window_bounds = array<i64: 1, 64>}, {transform_indices = @transform_5, window_bounds = array<i64: 64, 32>}, {pipeline_mode = #tpu.pipeline_mode<synchronous>, transform_indices = @transform_6, window_bounds = array<i64: 1, 32>}, {transform_indices = @transform_7, window_bounds = array<i64: 16, 32>}]} {
    %c0_i32 = arith.constant 0 : i32
    %0 = arith.cmpi eq, %arg1, %c0_i32 : i32
    %1 = arith.extui %0 : i1 to i32
    %c0_i32_0 = arith.constant 0 : i32
    %2 = arith.cmpi ne, %1, %c0_i32_0 : i32
    scf.if %2 {
      %c0_18 = arith.constant 0 : index
      %c0_19 = arith.constant 0 : index
      %25 = vector.load %arg2[%c0_18, %c0_19] : memref<16x32xf32, #tpu.memory_space<vmem>>, vector<16x32xf32>
      %c0_20 = arith.constant 0 : index
      %c0_21 = arith.constant 0 : index
      %26 = vector.load %arg3[%c0_20, %c0_21] : memref<16x1xf32, #tpu.memory_space<vmem>>, vector<16x1xf32>
      %c0_22 = arith.constant 0 : index
      %c0_23 = arith.constant 0 : index
      %27 = vector.load %arg4[%c0_22, %c0_23] : memref<16x1xf32, #tpu.memory_space<vmem>>, vector<16x1xf32>
      %cst_24 = arith.constant dense<0.000000e+00> : vector<16xf32>
      %28 = vector.multi_reduction <add>, %25, %cst_24 [1] : vector<16x32xf32> to vector<16xf32>
      %29 = vector.shape_cast %28 : vector<16xf32> to vector<16x1xf32>
      %cst_25 = arith.constant 3.200000e+01 : f32
      %30 = vector.broadcast %cst_25 : f32 to vector<16x1xf32>
      %31 = arith.divf %29, %30 : vector<16x1xf32>
      %32 = vector.broadcast %31 : vector<16x1xf32> to vector<16x32xf32>
      %33 = arith.subf %25, %32 : vector<16x32xf32>
      %34 = arith.mulf %33, %33 : vector<16x32xf32>
      %cst_26 = arith.constant dense<0.000000e+00> : vector<16xf32>
      %35 = vector.multi_reduction <add>, %34, %cst_26 [1] : vector<16x32xf32> to vector<16xf32>
      %36 = vector.shape_cast %35 : vector<16xf32> to vector<16x1xf32>
      %cst_27 = arith.constant 3.200000e+01 : f32
      %37 = vector.broadcast %cst_27 : f32 to vector<16x1xf32>
      %38 = arith.divf %36, %37 : vector<16x1xf32>
      %cst_28 = arith.constant 9.99999974E-6 : f32
      %39 = vector.broadcast %cst_28 : f32 to vector<16x1xf32>
      %40 = arith.addf %38, %39 : vector<16x1xf32>
      %41 = math.rsqrt %40 : vector<16x1xf32>
      %42 = vector.broadcast %41 : vector<16x1xf32> to vector<16x32xf32>
      %43 = arith.mulf %33, %42 : vector<16x32xf32>
      %44 = vector.broadcast %26 : vector<16x1xf32> to vector<16x32xf32>
      %45 = arith.mulf %43, %44 : vector<16x32xf32>
      %46 = vector.broadcast %27 : vector<16x1xf32> to vector<16x32xf32>
      %47 = arith.addf %45, %46 : vector<16x32xf32>
      %c0_29 = arith.constant 0 : index
      %c0_30 = arith.constant 0 : index
      %48 = vector.load %arg10[%c0_29, %c0_30] : memref<16x32xf32, #tpu.memory_space<vmem>>, vector<16x32xf32>
      tpu.vector_store %arg10[%c0_29, %c0_30], %47 {strides = array<i32>} : memref<16x32xf32, #tpu.memory_space<vmem>>, vector<16x32xf32>,
      %cst_31 = arith.constant 0.000000e+00 : f32
      %49 = vector.broadcast %cst_31 : f32 to vector<16x32xf32>
      %c0_32 = arith.constant 0 : index
      %c0_33 = arith.constant 0 : index
      %50 = vector.load %arg11[%c0_32, %c0_33] : memref<16x32xf32, #tpu.memory_space<vmem>>, vector<16x32xf32>
      tpu.vector_store %arg11[%c0_32, %c0_33], %49 {strides = array<i32>} : memref<16x32xf32, #tpu.memory_space<vmem>>, vector<16x32xf32>,
    } else {
    }
    %c0 = arith.constant 0 : index
    %c0_1 = arith.constant 0 : index
    %3 = vector.load %arg10[%c0, %c0_1] : memref<16x32xf32, #tpu.memory_space<vmem>>, vector<16x32xf32>
    %c0_2 = arith.constant 0 : index
    %c0_3 = arith.constant 0 : index
    %4 = vector.load %arg5[%c0_2, %c0_3] : memref<32x64xf32, #tpu.memory_space<vmem>>, vector<32x64xf32>
    %cst = arith.constant dense<0.000000e+00> : vector<16x64xf32>
    %5 = tpu.matmul %3, %4, %cst {dimension_numbers = #tpu.dot_dimension_numbers<[1], [0], [0], [1], [0, 0, 1, 1], [], []>} : vector<16x32xf32>, vector<32x64xf32>, vector<16x64xf32> -> vector<16x64xf32>
    %c0_4 = arith.constant 0 : index
    %c0_5 = arith.constant 0 : index
    %6 = vector.load %arg6[%c0_4, %c0_5] : memref<1x64xf32, #tpu.memory_space<vmem>>, vector<1x64xf32>
    %7 = vector.broadcast %6 : vector<1x64xf32> to vector<16x64xf32>
    %8 = arith.addf %5, %7 : vector<16x64xf32>
    %cst_6 = arith.constant 5.000000e-01 : f32
    %9 = vector.broadcast %cst_6 : f32 to vector<16x64xf32>
    %10 = arith.mulf %9, %8 : vector<16x64xf32>
    %cst_7 = arith.constant 0.707106769 : f32
    %11 = vector.broadcast %cst_7 : f32 to vector<16x64xf32>
    %12 = arith.mulf %8, %11 : vector<16x64xf32>
    %13 = math.erf %12 : vector<16x64xf32>
    %cst_8 = arith.constant 1.000000e+00 : f32
    %14 = vector.broadcast %cst_8 : f32 to vector<16x64xf32>
    %15 = arith.addf %14, %13 : vector<16x64xf32>
    %16 = arith.mulf %10, %15 : vector<16x64xf32>
    %c0_9 = arith.constant 0 : index
    %c0_10 = arith.constant 0 : index
    %17 = vector.load %arg11[%c0_9, %c0_10] : memref<16x32xf32, #tpu.memory_space<vmem>>, vector<16x32xf32>
    %c0_11 = arith.constant 0 : index
    %c0_12 = arith.constant 0 : index
    %18 = vector.load %arg7[%c0_11, %c0_12] : memref<64x32xf32, #tpu.memory_space<vmem>>, vector<64x32xf32>
    %cst_13 = arith.constant dense<0.000000e+00> : vector<16x32xf32>
    %19 = tpu.matmul %16, %18, %cst_13 {dimension_numbers = #tpu.dot_dimension_numbers<[1], [0], [0], [1], [0, 0, 1, 1], [], []>} : vector<16x64xf32>, vector<64x32xf32>, vector<16x32xf32> -> vector<16x32xf32>
    %20 = arith.addf %17, %19 : vector<16x32xf32>
    %c0_14 = arith.constant 0 : index
    %c0_15 = arith.constant 0 : index
    %21 = vector.load %arg11[%c0_14, %c0_15] : memref<16x32xf32, #tpu.memory_space<vmem>>, vector<16x32xf32>
    tpu.vector_store %arg11[%c0_14, %c0_15], %20 {strides = array<i32>} : memref<16x32xf32, #tpu.memory_space<vmem>>, vector<16x32xf32>,
    %c0_i32_16 = arith.constant 0 : i32
    %22 = arith.cmpi eq, %arg1, %c0_i32_16 : i32
    %23 = arith.extui %22 : i1 to i32
    %c0_i32_17 = arith.constant 0 : i32
    %24 = arith.cmpi ne, %23, %c0_i32_17 : i32
    scf.if %24 {
      %c0_18 = arith.constant 0 : index
      %c0_19 = arith.constant 0 : index
      %25 = vector.load %arg11[%c0_18, %c0_19] : memref<16x32xf32, #tpu.memory_space<vmem>>, vector<16x32xf32>
      %c0_20 = arith.constant 0 : index
      %c0_21 = arith.constant 0 : index
      %26 = vector.load %arg8[%c0_20, %c0_21] : memref<1x32xf32, #tpu.memory_space<vmem>>, vector<1x32xf32>
      %27 = vector.broadcast %26 : vector<1x32xf32> to vector<16x32xf32>
      %28 = arith.addf %25, %27 : vector<16x32xf32>
      %c0_22 = arith.constant 0 : index
      %c0_23 = arith.constant 0 : index
      %29 = vector.load %arg2[%c0_22, %c0_23] : memref<16x32xf32, #tpu.memory_space<vmem>>, vector<16x32xf32>
      %30 = arith.addf %28, %29 : vector<16x32xf32>
      %c0_24 = arith.constant 0 : index
      %c0_25 = arith.constant 0 : index
      %31 = vector.load %arg9[%c0_24, %c0_25] : memref<16x32xf32, #tpu.memory_space<vmem>>, vector<16x32xf32>
      tpu.vector_store %arg9[%c0_24, %c0_25], %30 {strides = array<i32>} : memref<16x32xf32, #tpu.memory_space<vmem>>, vector<16x32xf32>,
    } else {
    }
    return
  }
  func.func @transform_0(%arg0: i32, %arg1: i32) -> (i32, i32) {
    %c0_i32 = arith.constant 0 : i32
    %c0_i32_0 = arith.constant 0 : i32
    return %arg0, %c0_i32 : i32, i32
  }
  func.func @transform_1(%arg0: i32, %arg1: i32) -> (i32, i32) {
    %c0_i32 = arith.constant 0 : i32
    %c0_i32_0 = arith.constant 0 : i32
    %c0_i32_1 = arith.constant 0 : i32
    return %c0_i32, %c0_i32_0 : i32, i32
  }
  func.func @transform_2(%arg0: i32, %arg1: i32) -> (i32, i32) {
    %c0_i32 = arith.constant 0 : i32
    %c0_i32_0 = arith.constant 0 : i32
    %c0_i32_1 = arith.constant 0 : i32
    return %c0_i32, %c0_i32_0 : i32, i32
  }
  func.func @transform_3(%arg0: i32, %arg1: i32) -> (i32, i32) {
    %c0_i32 = arith.constant 0 : i32
    %c0_i32_0 = arith.constant 0 : i32
    return %c0_i32, %arg1 : i32, i32
  }
  func.func @transform_4(%arg0: i32, %arg1: i32) -> (i32, i32) {
    %c0_i32 = arith.constant 0 : i32
    %c0_i32_0 = arith.constant 0 : i32
    return %c0_i32, %arg1 : i32, i32
  }
  func.func @transform_5(%arg0: i32, %arg1: i32) -> (i32, i32) {
    %c0_i32 = arith.constant 0 : i32
    %c0_i32_0 = arith.constant 0 : i32
    return %arg1, %c0_i32 : i32, i32
  }
  func.func @transform_6(%arg0: i32, %arg1: i32) -> (i32, i32) {
    %c0_i32 = arith.constant 0 : i32
    %c0_i32_0 = arith.constant 0 : i32
    %c0_i32_1 = arith.constant 0 : i32
    return %c0_i32, %c0_i32_0 : i32, i32
  }
  func.func @transform_7(%arg0: i32, %arg1: i32) -> (i32, i32) {
    %c0_i32 = arith.constant 0 : i32
    %c0_i32_0 = arith.constant 0 : i32
    return %arg0, %c0_i32 : i32, i32
  }
}

</mosaic_0001>

<bundles_post_ra>
// kernel: tpu_custom_call.1
= control target key start
LH: loop header
LB: loop body
LE: loop exit
PB: predicated region body
PF: predicated region fallthrough
CT: control target
= control target key end

     0   :  { %vm37_vm0 = vcmask 261120   ;;  %v445_v4 = vmov 0   ;;  %s586_s0 = inlined_call_operand.vmem [shape: f32[16,32], index: 0, kind: input, shape index: {}]   ;;  %s587_s1 = inlined_call_operand.vmem [shape: f32[16,1], index: 1, kind: input, shape index: {}]   ;;  %s588_s2 = inlined_call_operand.vmem [shape: f32[16,1], index: 2, kind: input, shape index: {}]   ;;  %s589_s3 = inlined_call_operand.vmem [shape: f32[32,64], index: 3, kind: input, shape index: {}]   ;;  %s590_s4 = inlined_call_operand.vmem [shape: f32[1,64], index: 4, kind: input, shape index: {}]   ;;  %s591_s5 = inlined_call_operand.vmem [shape: f32[64,32], index: 5, kind: input, shape index: {}]   ;;  %s592_s6 = inlined_call_operand.vmem [shape: f32[1,32], index: 6, kind: input, shape index: {}]   ;;  %s593_s7 = inlined_call_operand.hbm [shape: f32[16,32], index: 7, kind: output, shape index: {}]  }
   0x1   :  { %v493_v0 = vld [vmem:[%s586_s0] sm:$0xff]  ;;  %v498_v1 = vld [vmem:[%s586_s0 + $0x8] sm:$0xff]  ;;  %412 = vset.pattern.permute.xlu1 %v445_v4  ;;  %411 = vset.pattern.permute.xlu0 %v445_v4 }
   0x2   :  { %v34_v2 = vld [vmem:[%s587_s1 + $0x8] sm:$0xff]  ;;  %v38_v3 = vsel %vm37_vm0, %v493_v0, 0.0 }
   0x3   :  { %12 = vsyncpa [#allocation5], 0  ;;  %39 = vadd.xlane.f32.xlu0 %v38_v3  ;;  %72 = vperm.xlu1 %412, %v34_v2   ;;  %v41_v5 = vsel %vm37_vm0, %v498_v1, 0.0  ;;  %v35_v6 = vld [vmem:[%s588_s2] sm:$0xff]  ;;  %v36_v18 = vld [vmem:[%s588_s2 + $0x8] sm:$0xff]  ;;  %v446_v57 = vmov 0.0  }
   0x4   :  { %v33_v7 = vld [vmem:[%s587_s1] sm:$0xff]  ;;  %v96_v20 = vld [vmem:[%s589_s3 + $0x8] sm:$0xff]  ;;  %v97_v22 = vld [vmem:[%s589_s3 + $0x10] sm:$0xff]  ;;  %92 = vst.msk [vmem:[#allocation3 + $0x8] sm:$0xff] %vm37_vm0, %v446_v57  ;;  %vm208_vm1 = vcmask 523264   ;;  %s447_s11 = smov [#allocation4]  }
   0x5   :  { %v95_v19 = vld [vmem:[%s589_s3] sm:$0xff]  ;;  %v98_v23 = vld [vmem:[%s589_s3 + $0x18] sm:$0xff]  ;;  %v201_v46 = vld [vmem:[%s591_s5 + $0x8] sm:$0xff]  ;;  %91 = vst.msk [vmem:[#allocation3] sm:$0xff] %vm37_vm0, %v446_v57  ;;  %s319_s1 = sshll.u32 %s447_s11, 4  ;;  %s320_s1 = int_to_ptr.vmem [resolvable:$true] %s319_s1 }
   0x6   :  { %v382_v21 = vpack.c.bf16 %v96_v20, %v95_v19  ;;  %v386_v24 = vpack.c.bf16 %v98_v23, %v97_v22  ;;  %v200_v45 = vld [vmem:[%s591_s5] sm:$0xff]  ;;  %v202_v48 = vld [vmem:[%s591_s5 + $0x10] sm:$0xff]  ;;  %v203_v49 = vld [vmem:[%s591_s5 + $0x18] sm:$0xff]  ;;  %s421_s12 = scalar_lea.vmem %s320_s1, 256  ;;  %p426_p1 = scmp.lt.s32.totalorder %s320_s1, %s320_s1 }
   0x7   :  { %42 = vadd.xlane.f32.xlu0 %v41_v5  ;;  %79 = vperm.xlu1 %412, %v35_v6   ;;  %v390_v47 = vpack.c.bf16 %v201_v46, %v200_v45  ;;  %v394_v50 = vpack.c.bf16 %v203_v49, %v202_v48  ;;  %v204_v51 = vld [vmem:[%s591_s5 + $0x20] sm:$0xff]  ;;  %v205_v52 = vld [vmem:[%s591_s5 + $0x28] sm:$0xff]  ;;  %v206_v54 = vld [vmem:[%s591_s5 + $0x30] sm:$0xff]  ;;  %p422_p0 = scmp.ne.s32.totalorder %s320_s1, %s421_s12  ;;  %p427_p2 = scmp.lt.s32.totalorder %s421_s12, %s421_s12 }
   0x8   :  { %383 = vmatprep.subr.bf16.mxu0 %v382_v21  ;;  %v398_v53 = vpack.c.bf16 %v205_v52, %v204_v51  ;;  %v207_v55 = vld [vmem:[%s591_s5 + $0x38] sm:$0xff]  ;;  %v330_v58 = vld [vmem:[%s590_s4] ss:$0 sm:$0xff] }
   0x9   :  { %385 = vmatpush3.bf16.msra.mxu0 %v382_v21  ;;  %391 = vmatprep.subr.bf16.mxu1 %v390_v47  ;;  %v402_v56 = vpack.c.bf16 %v207_v55, %v206_v54  ;;  %p428_p3 = por %p427_p2, %p426_p1 }
   0xa   :  { %387 = vmatprep.subr.bf16.mxu0 %v386_v24  ;;  %393 = vmatpush3.bf16.msra.mxu1 %v390_v47 }
   0xb   :  { %395 = vmatprep.subr.bf16.mxu1 %v394_v50  ;;  %p429_p4 = pnand %p428_p3, %p422_p0 }
   0xd   :  { %389 = vmatpush3.bf16.msra.mxu0 %v386_v24 }
   0xe   :  { %397 = vmatpush3.bf16.msra.mxu1 %v394_v50 }
   0xf   :  { %399 = vmatprep.subr.bf16.mxu1 %v398_v53 }
  0x12   :  { %401 = vmatpush3.bf16.msra.mxu1 %v398_v53 }
  0x13   :  { %403 = vmatprep.subr.bf16.mxu1 %v402_v56 }
  0x16   :  { %405 = vmatpush3.bf16.msra.mxu1 %v402_v56 }
  0x1d   :  { %67 = vperm.xlu0 %411, %v33_v7  }
  0x82   :  { %v73_v25 = vpop.permute.xlu1 %72 }
  0x86   :  { %v80_v26 = vpop.permute.xlu1 %79 }
  0x90   :  { %v40_v8 = vpop.xlane.xlu0 %39 }
  0x91   :  { %v45_v9 = vmul.f32 0.03125, %v40_v8 }
  0x93   :  { %v47_v10 = vsub.f32 %v493_v0, %v45_v9 }
  0x94   :  { %v43_v11 = vpop.xlane.xlu0 %42 }
  0x95   :  { %v46_v12 = vmul.f32 0.03125, %v43_v11  ;;  %v49_v13 = vmul.f32 %v47_v10, %v47_v10  ;;  %v199_v11 = vld [vmem:[#allocation3 + $0x8] sm:$0xff] }
  0x97   :  { %v48_v14 = vsub.f32 %v498_v1, %v46_v12  ;;  %v51_v15 = vsel %vm37_vm0, %v49_v13, 0.0  ;;  %v198_v12 = vld [vmem:[#allocation3] sm:$0xff] }
  0x98   :  { %52 = vadd.xlane.f32.xlu1 %v51_v15 }
  0x99   :  { %v50_v16 = vmul.f32 %v48_v14, %v48_v14 }
  0x9b   :  { %v54_v17 = vsel %vm37_vm0, %v50_v16, 0.0 }
  0x9c   :  { %55 = vadd.xlane.f32.xlu1 %v54_v17  ;;  %v68_v34 = vpop.permute.xlu0 %67  ;;  %v335_v17 = vld [vmem:[%s592_s6] ss:$0 sm:$0xff] }
  0xad   :  { %84 = vperm.xlu1 %412, %v36_v18  }
 0x125   :  { %v53_v27 = vpop.xlane.xlu1 %52 }
 0x126   :  { %v57_v28 = vmul.f32 0.03125, %v53_v27 }
 0x128   :  { %v59_v29 = vadd.f32 1e-05, %v57_v28 }
 0x129   :  { %v56_v30 = vpop.xlane.xlu1 %55 }
 0x12a   :  { %413 = vrsqrt.f32 %v59_v29  ;;  %v58_v31 = vmul.f32 0.03125, %v56_v30 }
 0x12c   :  { %v60_v32 = vadd.f32 1e-05, %v58_v31 }
 0x12d   :  { %v85_v41 = vpop.permute.xlu1 %84 }
 0x12e   :  { %415 = vrsqrt.f32 %v60_v32 }
 0x134   :  { %v414_v33 = vpop.eup %413 }
 0x135   :  { %v63_v35 = vmul.f32 %v414_v33, %v47_v10 }
 0x137   :  { %v75_v36 = vmul.f32 %v68_v34, %v63_v35 }
 0x138   :  { %v416_v37 = vpop.eup %415 }
 0x139   :  { %v64_v38 = vmul.f32 %v416_v37, %v48_v14  ;;  %v87_v39 = vadd.f32 %v80_v26, %v75_v36 }
 0x13b   :  { %v76_v40 = vmul.f32 %v73_v25, %v64_v38  ;;  %89 = vst.msk [vmem:[#allocation2] sm:$0xff] %vm37_vm0, %v87_v39 }
 0x13d   :  { %v88_v42 = vadd.f32 %v85_v41, %v76_v40 }
 0x13f   :  { %90 = vst.msk [vmem:[#allocation2 + $0x8] sm:$0xff] %vm37_vm0, %v88_v42 }
 0x142   :  { %v93_v43 = vld [vmem:[#allocation2] sm:$0xff] }
 0x143   :  { %360 = vmatprep.mubr.msk.f32.mxu0 %vm37_vm0, %v93_v43 }
 0x146   :  { %v94_v44 = vld [vmem:[#allocation2 + $0x8] sm:$0xff] }
 0x147   :  { %361 = vmatmul.mubr.msk.f32.vlgmr.msra.gmra.mrb[0].mxu0 %vm37_vm0, %v94_v44 }
 0x21a   :  { %v362_v59 = vpop.f32.mrb[0].mxu0 }
 0x21b   :  { %v185_v60 = vadd.f32 %v362_v59, %v330_v58  ;;  %v179_v61 = vpop.f32.mrb[1].mxu0 }
 0x21c   :  { %v180_v62 = vadd.f32 %v330_v58, %v179_v61 }
 0x21d   :  { %v191_v63 = vmul.f32 0.70710677, %v185_v60  ;;  %v189_v8 = vmul.f32 0.5, %v185_v60 }
 0x21e   :  { %v190_v2 = vmul.f32 0.70710677, %v180_v62  ;;  %v188_v6 = vmul.f32 0.5, %v180_v62 }
 0x21f   :  { %417 = verf.f32 %v191_v63 }
 0x220   :  { %419 = verf.f32 %v190_v2 }
 0x229   :  { %v418_v3 = vpop.eup %417 }
 0x22a   :  { %v420_v4 = vpop.eup %419  ;;  %v195_v5 = vadd.f32 1.0, %v418_v3 }
 0x22b   :  { %v194_v7 = vadd.f32 1.0, %v420_v4 }
 0x22c   :  { %v197_v10 = vmul.f32 %v195_v5, %v189_v8 }
 0x22d   :  { %v196_v9 = vmul.f32 %v194_v7, %v188_v6 }
 0x22f   :  { %379 = vmatprep.mubr.msk.f32.mxu1 %vm208_vm1, %v196_v9 }
 0x230   :  { %380 = vmatmul.mubr.msk.f32.vlgmr.msra.gmra.mrb[0].mxu1 %vm208_vm1, %v197_v10 }
 0x303   :  { %v381_v13 = vpop.f32.mrb[0].mxu1 }
 0x304   :  { %v291_v14 = vadd.f32 %v381_v13, %v199_v11  ;;  %v281_v15 = vpop.f32.mrb[1].mxu1 }
 0x305   :  { %v290_v16 = vadd.f32 %v281_v15, %v198_v12 }
 0x306   :  { %293 = vst.msk [vmem:[#allocation3 + $0x8] sm:$0xff] %vm37_vm0, %v291_v14 }
 0x307   :  { %292 = vst.msk [vmem:[#allocation3] sm:$0xff] %vm37_vm0, %v290_v16 }
 0x30d   :  { %v298_v18 = vld [vmem:[#allocation3 + $0x8] sm:$0xff] }
 0x30e   :  { %v297_v19 = vld [vmem:[#allocation3] sm:$0xff]  ;;  %v307_v20 = vadd.f32 %v335_v17, %v298_v18 }
 0x30f   :  { %v306_v21 = vadd.f32 %v335_v17, %v297_v19 }
 0x310   :  { %v311_v22 = vadd.f32 %v307_v20, %v498_v1 }
 0x311   :  { %v310_v23 = vadd.f32 %v306_v21, %v493_v0 }
 0x312   :  { %313 = vst.msk [vmem:[#allocation4 + $0x8] sm:$0xff] %vm37_vm0, %v311_v22 }
 0x313   :  { %312 = vst.msk [vmem:[#allocation4] sm:$0xff] %vm37_vm0, %v310_v23 }
 0x314   :  { %432 = shalt.err (!%p429_p4)
}
 0x315   :  { %s433_s14 = scalar_lea.hbm %s593_s7, 256 }
 0x316   :  { %p434_p5 = scmp.ne.s32.totalorder %s593_s7, %s433_s14  ;;  %p437_p6 = scmp.lt.u32.totalorder %s433_s14, %s593_s7 }
 0x318   :  { %p439_p7 = pnand %p437_p6, %p434_p5 }
 0x31a   :  { %442 = shalt.err (!%p439_p7)
}
 0x31b   :  { %s448_s2 = smov 128   ;;  %s449_s3 = smov 8  }
 0x31c   :  { %325 = dma.vmem_to_hbm [thread:$0]  %s320_s1, 256, %s593_s7, [#allocation5], %s448_s2, %s448_s2, %s449_s3  }
 0x31d   :  { %443 = dma.done.wait [#allocation5], 256  }
 0x31e   :  { %444 = vsyncadd [#allocation5], 4294967040 }
 0x31f   :  { %329 = vsyncpa [#allocation5], 1 }

</bundles_post_ra>
